<compile_context>
chip_gen: v6e
topology: v6e:2x2x1
jax: 0.10.0
libtpu: 0.0.40
codegen_flags: <defaults>
</compile_context>

<pallas_src>
import jax
import jax.numpy as jnp
from jax.experimental import pallas as pl
from jax.experimental.pallas import tpu as pltpu

IMG_FEAT = 2048        # ResNet50 penultimate features (fc replaced by Identity)
TXT_FEAT = 768         # BERT-base hidden_size (CLS token)
NUM_LABELS = 3
PAD_LABELS = 128       # lane-dense output width; true logits live in [:, :3]


def _fusion_kernel(img_ref, txt_ref, w_img_ref, w_txt_ref, b_ref, out_ref):
    # logits = concat([img, txt], -1) @ W^T + b
    #        = img @ W_img + txt @ W_txt + b   (W stored transposed + lane-padded)
    # bf16 cast happens in-kernel (free VPU work, hidden under the input DMA),
    # accumulation stays f32 via preferred_element_type.
    img = img_ref[...].astype(jnp.bfloat16)
    txt = txt_ref[...].astype(jnp.bfloat16)
    acc = jnp.dot(img, w_img_ref[...], preferred_element_type=jnp.float32)
    acc = acc + jnp.dot(txt, w_txt_ref[...], preferred_element_type=jnp.float32)
    out_ref[...] = (acc + b_ref[...]).astype(out_ref.dtype)


def _round_up(x, m):
    return ((x + m - 1) // m) * m


def fusion_forward(image_features, text_features, w_img, w_txt, bias,
                   *, tile_b_cap=1024):
    """Pallas equivalent of:
         fused  = torch.cat([img.unsqueeze(1), txt.unsqueeze(1)], dim=2)
         logits = self.fusion_layer(fused).squeeze()
       image_features: (B, 2048), text_features: (B, 768) -> logits (B, 3)
       (or (3,) for B == 1, matching torch .squeeze()).
    """
    B = image_features.shape[0]

    # Round the batch only to a multiple of 16 (bf16 sublane packing for the
    # output tile). Zero-copy when B is already aligned; otherwise <=15 pad rows.
    pB = _round_up(B, 16)
    img = image_features.astype(jnp.float32)
    txt = text_features.astype(jnp.float32)
    if pB != B:
        img = jnp.pad(img, ((0, pB - B), (0, 0)))
        txt = jnp.pad(txt, ((0, pB - B), (0, 0)))

    # Batch tile: cap at 1024 rows (f32 inputs -> ~25 MiB VMEM with double
    # buffering, safe on v7x's 64 MiB). If the whole batch fits one tile, split
    # into >=2 grid steps so the "parallel" axis shards over v7x's 2 TCs.
    tile_b = min(tile_b_cap, pB)
    if tile_b == pB and pB >= 32:
        tile_b = _round_up((pB + 1) // 2, 16)
    grid = (pl.cdiv(pB, tile_b),)   # last block may be ragged; Pallas pads it.

    w_img_b = w_img.astype(jnp.bfloat16)      # (2048, 128)
    w_txt_b = w_txt.astype(jnp.bfloat16)      # (768, 128)
    bias_f32 = bias.astype(jnp.float32)       # (1, 128)

    cost = pl.CostEstimate(
        flops=2 * B * (IMG_FEAT + TXT_FEAT) * PAD_LABELS,
        transcendentals=0,
        bytes_accessed=(B * (IMG_FEAT + TXT_FEAT) * 4            # f32 activations
                        + (IMG_FEAT + TXT_FEAT) * PAD_LABELS * 2  # bf16 weights
                        + PAD_LABELS * 4                          # f32 bias
                        + B * PAD_LABELS * 2))                    # bf16 output

    logits_padded = pl.pallas_call(
        _fusion_kernel,
        out_shape=jax.ShapeDtypeStruct((pB, PAD_LABELS), jnp.bfloat16),
        grid_spec=pltpu.PrefetchScalarGridSpec(
            num_scalar_prefetch=0,
            grid=grid,
            in_specs=[
                pl.BlockSpec((tile_b, IMG_FEAT), lambda i: (i, 0)),
                pl.BlockSpec((tile_b, TXT_FEAT), lambda i: (i, 0)),
                pl.BlockSpec((IMG_FEAT, PAD_LABELS), lambda i: (0, 0)),
                pl.BlockSpec((TXT_FEAT, PAD_LABELS), lambda i: (0, 0)),
                pl.BlockSpec((1, PAD_LABELS), lambda i: (0, 0)),
            ],
            out_specs=pl.BlockSpec((tile_b, PAD_LABELS), lambda i: (i, 0)),
        ),
        compiler_params=pltpu.CompilerParams(
            dimension_semantics=("parallel",),
            vmem_limit_bytes=48 << 20,
        ),
        cost_estimate=cost,
    )(img, txt, w_img_b, w_txt_b, bias_f32)

    logits = logits_padded[:B, :NUM_LABELS].astype(jnp.float32)
    if B == 1:
        # torch .squeeze() on (1, 1, 3) -> (3,)
        logits = logits[0]
    return logits


def init_fusion_params(key):
    """Deterministic init of nn.Linear(2048 + 768, num_labels), lane-padded."""
    in_features = IMG_FEAT + TXT_FEAT
    k_w, k_b = jax.random.split(key)
    bound = 1.0 / jnp.sqrt(in_features)
    # PyTorch Linear weight is (num_labels, in_features); we store W^T, split
    # into image/text halves, and zero-pad the label dim to 128 lanes.
    w_t = jax.random.uniform(k_w, (in_features, NUM_LABELS),
                             minval=-bound, maxval=bound, dtype=jnp.float32)
    b = jax.random.uniform(k_b, (NUM_LABELS,),
                           minval=-bound, maxval=bound, dtype=jnp.float32)
    w_pad = jnp.zeros((in_features, PAD_LABELS), jnp.float32)
    w_pad = w_pad.at[:, :NUM_LABELS].set(w_t)
    b_pad = jnp.zeros((1, PAD_LABELS), jnp.float32)
    b_pad = b_pad.at[0, :NUM_LABELS].set(b)
    w_img = w_pad[:IMG_FEAT]        # (2048, 128)
    w_txt = w_pad[IMG_FEAT:]        # (768, 128)
    return w_img, w_txt, b_pad


if __name__ == "__main__":
    key = jax.random.PRNGKey(0)
    k_img, k_txt, k_param = jax.random.split(key, 3)

    B = 2
    # Backbone outputs (frozen ResNet50 pooled features / BERT CLS hidden state).
    image_features = jax.random.normal(k_img, (B, IMG_FEAT), dtype=jnp.float32)
    text_features = jax.random.normal(k_txt, (B, TXT_FEAT), dtype=jnp.float32)

    w_img, w_txt, bias = init_fusion_params(k_param)

    logits = fusion_forward(image_features, text_features, w_img, w_txt, bias)
    logits = jax.block_until_ready(logits)

    # Pure-JAX reference following the same numeric path (bf16 operands,
    # f32 accumulation, bf16 store).
    img_b = image_features.astype(jnp.bfloat16)
    txt_b = text_features.astype(jnp.bfloat16)
    ref_full = (jnp.dot(img_b, w_img.astype(jnp.bfloat16),
                        preferred_element_type=jnp.float32)
                + jnp.dot(txt_b, w_txt.astype(jnp.bfloat16),
                          preferred_element_type=jnp.float32)
                + bias)
    ref = ref_full[:, :NUM_LABELS].astype(jnp.bfloat16).astype(jnp.float32)

    assert logits.shape == (B, NUM_LABELS), logits.shape
    assert jnp.allclose(logits, ref, atol=2e-2, rtol=2e-2), (
        jnp.max(jnp.abs(logits - ref)))

    print("KERNEL_OK")
</pallas_src>

<mosaic_0001>
module attributes {stable_mosaic.version = 11 : i64} {
  func.func @_fusion_kernel(%arg0: i32, %arg1: memref<16x2048xf32, #tpu.memory_space<vmem>>, %arg2: memref<16x768xf32, #tpu.memory_space<vmem>>, %arg3: memref<2048x128xbf16, #tpu.memory_space<vmem>>, %arg4: memref<768x128xbf16, #tpu.memory_space<vmem>>, %arg5: memref<1x128xf32, #tpu.memory_space<vmem>>, %arg6: memref<16x128xbf16, #tpu.memory_space<vmem>>) attributes {dimension_semantics = [#tpu.dimension_semantics<parallel>], iteration_bounds = array<i64: 1>, scalar_prefetch = 0 : i64, scratch_operands = 0 : i64, tpu.core_type = #tpu.core_type<tc>, window_params = [{transform_indices = @transform_0, window_bounds = array<i64: 16, 2048>}, {transform_indices = @transform_1, window_bounds = array<i64: 16, 768>}, {pipeline_mode = #tpu.pipeline_mode<synchronous>, transform_indices = @transform_2, window_bounds = array<i64: 2048, 128>}, {pipeline_mode = #tpu.pipeline_mode<synchronous>, transform_indices = @transform_3, window_bounds = array<i64: 768, 128>}, {pipeline_mode = #tpu.pipeline_mode<synchronous>, transform_indices = @transform_4, window_bounds = array<i64: 1, 128>}, {transform_indices = @transform_5, window_bounds = array<i64: 16, 128>}]} {
    %c0 = arith.constant 0 : index
    %c0_0 = arith.constant 0 : index
    %0 = vector.load %arg1[%c0, %c0_0] : memref<16x2048xf32, #tpu.memory_space<vmem>>, vector<16x2048xf32>
    %1 = arith.truncf %0 : vector<16x2048xf32> to vector<16x2048xbf16>
    %c0_1 = arith.constant 0 : index
    %c0_2 = arith.constant 0 : index
    %2 = vector.load %arg2[%c0_1, %c0_2] : memref<16x768xf32, #tpu.memory_space<vmem>>, vector<16x768xf32>
    %3 = arith.truncf %2 : vector<16x768xf32> to vector<16x768xbf16>
    %c0_3 = arith.constant 0 : index
    %c0_4 = arith.constant 0 : index
    %4 = vector.load %arg3[%c0_3, %c0_4] : memref<2048x128xbf16, #tpu.memory_space<vmem>>, vector<2048x128xbf16>
    %cst = arith.constant dense<0.000000e+00> : vector<16x128xf32>
    %5 = tpu.matmul %1, %4, %cst {dimension_numbers = #tpu.dot_dimension_numbers<[1], [0], [0], [1], [0, 0, 1, 1], [], []>} : vector<16x2048xbf16>, vector<2048x128xbf16>, vector<16x128xf32> -> vector<16x128xf32>
    %c0_5 = arith.constant 0 : index
    %c0_6 = arith.constant 0 : index
    %6 = vector.load %arg4[%c0_5, %c0_6] : memref<768x128xbf16, #tpu.memory_space<vmem>>, vector<768x128xbf16>
    %cst_7 = arith.constant dense<0.000000e+00> : vector<16x128xf32>
    %7 = tpu.matmul %3, %6, %cst_7 {dimension_numbers = #tpu.dot_dimension_numbers<[1], [0], [0], [1], [0, 0, 1, 1], [], []>} : vector<16x768xbf16>, vector<768x128xbf16>, vector<16x128xf32> -> vector<16x128xf32>
    %8 = arith.addf %5, %7 : vector<16x128xf32>
    %c0_8 = arith.constant 0 : index
    %c0_9 = arith.constant 0 : index
    %9 = vector.load %arg5[%c0_8, %c0_9] : memref<1x128xf32, #tpu.memory_space<vmem>>, vector<1x128xf32>
    %10 = vector.broadcast %9 : vector<1x128xf32> to vector<16x128xf32>
    %11 = arith.addf %8, %10 : vector<16x128xf32>
    %12 = arith.truncf %11 : vector<16x128xf32> to vector<16x128xbf16>
    %c0_10 = arith.constant 0 : index
    %c0_11 = arith.constant 0 : index
    %13 = vector.load %arg6[%c0_10, %c0_11] : memref<16x128xbf16, #tpu.memory_space<vmem>>, vector<16x128xbf16>
    tpu.vector_store %arg6[%c0_10, %c0_11], %12 {strides = array<i32>} : memref<16x128xbf16, #tpu.memory_space<vmem>>, vector<16x128xbf16>,
    return
  }
  func.func @transform_0(%arg0: i32) -> (i32, i32) {
    %c0_i32 = arith.constant 0 : i32
    %c0_i32_0 = arith.constant 0 : i32
    return %arg0, %c0_i32 : i32, i32
  }
  func.func @transform_1(%arg0: i32) -> (i32, i32) {
    %c0_i32 = arith.constant 0 : i32
    %c0_i32_0 = arith.constant 0 : i32
    return %arg0, %c0_i32 : i32, i32
  }
  func.func @transform_2(%arg0: i32) -> (i32, i32) {
    %c0_i32 = arith.constant 0 : i32
    %c0_i32_0 = arith.constant 0 : i32
    %c0_i32_1 = arith.constant 0 : i32
    return %c0_i32, %c0_i32_0 : i32, i32
  }
  func.func @transform_3(%arg0: i32) -> (i32, i32) {
    %c0_i32 = arith.constant 0 : i32
    %c0_i32_0 = arith.constant 0 : i32
    %c0_i32_1 = arith.constant 0 : i32
    return %c0_i32, %c0_i32_0 : i32, i32
  }
  func.func @transform_4(%arg0: i32) -> (i32, i32) {
    %c0_i32 = arith.constant 0 : i32
    %c0_i32_0 = arith.constant 0 : i32
    %c0_i32_1 = arith.constant 0 : i32
    return %c0_i32, %c0_i32_0 : i32, i32
  }
  func.func @transform_5(%arg0: i32) -> (i32, i32) {
    %c0_i32 = arith.constant 0 : i32
    %c0_i32_0 = arith.constant 0 : i32
    return %arg0, %c0_i32 : i32, i32
  }
}

</mosaic_0001>

<bundles_post_ra>
// kernel: tpu_custom_call.1
= control target key start
LH: loop header
LB: loop body
LE: loop exit
PB: predicated region body
PF: predicated region fallthrough
CT: control target
= control target key end

     0   :  { %10 = vsyncpa [#allocation3], 0  ;;  %s2831_s0 = inlined_call_operand.hbm [shape: f32[16,2048], index: 0, kind: input, shape index: {}]   ;;  %s2832_s1 = inlined_call_operand.hbm [shape: f32[16,768], index: 1, kind: input, shape index: {}]   ;;  %s2833_s2 = inlined_call_operand.hbm [shape: bf16[2048,128], index: 2, kind: input, shape index: {}]   ;;  %s2834_s3 = inlined_call_operand.hbm [shape: bf16[768,128], index: 3, kind: input, shape index: {}]   ;;  %s2835_s4 = inlined_call_operand.vmem [shape: f32[1,128], index: 4, kind: input, shape index: {}]   ;;  %s2836_s5 = inlined_call_operand.hbm [shape: bf16[16,128], index: 5, kind: output, shape index: {}]  }
   0x1   :  { %11 = vsyncpa [#allocation6], 0 }
   0x2   :  { %12 = vsyncpa [#allocation9], 0 }
   0x3   :  { %13 = vsyncpa [#allocation4], 0  ;;  %s2763_s18 = smov [#allocation5]  }
   0x4   :  { %s31_s19 = sshll.u32 %s2763_s18, 4  ;;  %s32_s19 = int_to_ptr.vmem [resolvable:$true] %s31_s19 }
   0x5   :  { %s2663_s20 = scalar_lea.vmem %s32_s19, 1536  ;;  %p2668_p1 = scmp.lt.s32.totalorder %s32_s19, %s32_s19 }
   0x6   :  { %p2664_p0 = scmp.ne.s32.totalorder %s32_s19, %s2663_s20  ;;  %p2669_p2 = scmp.lt.s32.totalorder %s2663_s20, %s2663_s20 }
   0x8   :  { %p2670_p3 = por %p2669_p2, %p2668_p1 }
   0xa   :  { %p2671_p4 = pnand %p2670_p3, %p2664_p0 }
   0xc   :  { %2674 = shalt.err (!%p2671_p4)
}
   0xd   :  { %s2764_s21 = smov 768   ;;  %s2765_s22 = smov 48  }
   0xe   :  { %37 = dma.hbm_to_vmem [thread:$0]  %s2832_s1, 1536, %s32_s19, [#allocation6], %s2764_s21, %s2764_s21, %s2765_s22  }
   0xf   :  { %s2766_s25 = smov [#allocation2]  }
  0x10   :  { %s19_s26 = sshll.u32 %s2766_s25, 4  ;;  %s20_s26 = int_to_ptr.vmem [resolvable:$true] %s19_s26 }
  0x11   :  { %s2683_s27 = scalar_lea.vmem %s20_s26, 4096  ;;  %p2688_p6 = scmp.lt.s32.totalorder %s20_s26, %s20_s26 }
  0x12   :  { %p2684_p5 = scmp.ne.s32.totalorder %s20_s26, %s2683_s27  ;;  %p2689_p7 = scmp.lt.s32.totalorder %s2683_s27, %s2683_s27 }
  0x14   :  { %p2690_p8 = por %p2689_p7, %p2688_p6 }
  0x16   :  { %p2691_p9 = pnand %p2690_p8, %p2684_p5 }
  0x18   :  { %2694 = shalt.err (!%p2691_p9)
}
  0x19   :  { %s2767_s28 = smov 2048   ;;  %s2768_s29 = smov 128  }
  0x1a   :  { %25 = dma.hbm_to_vmem [thread:$0]  %s2831_s0, 4096, %s20_s26, [#allocation3], %s2767_s28, %s2767_s28, %s2768_s29  }
  0x1b   :  { %s2769_s7 = smov [#allocation7]  }
  0x1c   :  { %s43_s8 = sshll.u32 %s2769_s7, 4  ;;  %s44_s8 = int_to_ptr.vmem [resolvable:$true] %s43_s8 }
  0x1d   :  { %s2703_s1 = scalar_lea.vmem %s44_s8, 16384  ;;  %p2708_p11 = scmp.lt.s32.totalorder %s44_s8, %s44_s8 }
  0x1e   :  { %p2704_p10 = scmp.ne.s32.totalorder %s44_s8, %s2703_s1  ;;  %p2709_p12 = scmp.lt.s32.totalorder %s2703_s1, %s2703_s1 }
  0x20   :  { %p2710_p13 = por %p2709_p12, %p2708_p11 }
  0x22   :  { %p2711_p0 = pnand %p2710_p13, %p2704_p10 }
  0x24   :  { %2714 = shalt.err (!%p2711_p0)
}
  0x25   :  { %s2770_s9 = smov 64   ;;  %s2771_s10 = smov 4  }
  0x26   :  { %49 = dma.hbm_to_vmem [thread:$0]  %s2833_s2, 16384, %s44_s8, [#allocation6], %s2770_s9, %s2770_s9, %s2771_s10  }
  0x27   :  { %s2772_s0 = smov [#allocation8]  }
  0x28   :  { %s55_s13 = sshll.u32 %s2772_s0, 4  ;;  %s56_s13 = int_to_ptr.vmem [resolvable:$true] %s55_s13 }
  0x29   :  { %s2723_s14 = scalar_lea.vmem %s56_s13, 6144  ;;  %p2728_p2 = scmp.lt.s32.totalorder %s56_s13, %s56_s13 }
  0x2a   :  { %p2724_p1 = scmp.ne.s32.totalorder %s56_s13, %s2723_s14  ;;  %p2729_p3 = scmp.lt.s32.totalorder %s2723_s14, %s2723_s14 }
  0x2c   :  { %p2730_p4 = por %p2729_p3, %p2728_p2 }
  0x2e   :  { %p2731_p5 = pnand %p2730_p4, %p2724_p1 }
  0x30   :  { %2734 = shalt.err (!%p2731_p5)
}
  0x31   :  { %61 = dma.hbm_to_vmem [thread:$0]  %s2834_s3, 6144, %s56_s13, [#allocation9], %s2770_s9, %s2770_s9, %s2771_s10  }
  0x32   :  { %2755 = dma.done.wait [#allocation3], 4096  }
  0x33   :  { %2756 = vsyncadd [#allocation3], 4294963200 }
  0x34   :  { %2757 = dma.done.wait [#allocation6], 17920  }
  0x35   :  { %2758 = vsyncadd [#allocation6], 4294949376 }
  0x36   :  { %2759 = dma.done.wait [#allocation9], 6144  }
  0x37   :  { %2760 = vsyncadd [#allocation9], 4294961152  ;;  %v2479_v0 = vld [vmem:[#allocation8 + $0x78] sm:$0xff]   ;;  %v2483_v4 = vld [vmem:[#allocation8 + $0x70] sm:$0xff]   ;;  %s2773_s17 = smov [#allocation10]  }
  0x38   :  { %v2480_v1 = vld [vmem:[#allocation8 + $0xf8] sm:$0xff]   ;;  %2226 = vmatprep.subr.bf16.mxu0 %v2479_v0  ;;  %v2484_v5 = vld [vmem:[#allocation8 + $0xf0] sm:$0xff]   ;;  %v2487_v8 = vld [vmem:[#allocation8 + $0x68] sm:$0xff]   ;;  %s2026_s18 = sshll.u32 %s2773_s17, 4  ;;  %s2027_s18 = int_to_ptr.vmem [resolvable:$true] %s2026_s18 }
  0x39   :  { %v2481_v2 = vld [vmem:[#allocation8 + $0x38] sm:$0xff]   ;;  %2248 = vmatprep.subr.bf16.mxu1 %v2480_v1  ;;  %v2485_v6 = vld [vmem:[#allocation8 + $0x30] sm:$0xff]   ;;  %v2488_v9 = vld [vmem:[#allocation8 + $0xe8] sm:$0xff]   ;;  %s2735_s19 = scalar_lea.vmem %s2027_s18, 128  ;;  %p2740_p7 = scmp.lt.s32.totalorder %s2027_s18, %s2027_s18 }
  0x3a   :  { %v2482_v3 = vld [vmem:[#allocation8 + $0xb8] sm:$0xff]   ;;  %2227 = vmatpush3.bf16.msra.mxu0 %v2481_v2  ;;  %v2486_v7 = vld [vmem:[#allocation8 + $0xb0] sm:$0xff]   ;;  %v2489_v10 = vld [vmem:[#allocation8 + $0x28] sm:$0xff]   ;;  %p2736_p6 = scmp.ne.s32.totalorder %s2027_s18, %s2735_s19  ;;  %p2741_p8 = scmp.lt.s32.totalorder %s2735_s19, %s2735_s19 }
  0x3b   :  { %2249 = vmatpush3.bf16.msra.mxu1 %v2482_v3  ;;  %2228 = vmatprep.subr.bf16.mxu0 %v2483_v4  ;;  %v2490_v11 = vld [vmem:[#allocation8 + $0xa8] sm:$0xff]   ;;  %v2491_v12 = vld [vmem:[#allocation8 + $0x60] sm:$0xff]   ;;  %v2495_v16 = vld [vmem:[#allocation8 + $0x58] sm:$0xff]  }
  0x3c   :  { %2250 = vmatprep.subr.bf16.mxu1 %v2484_v5  ;;  %v2492_v13 = vld [vmem:[#allocation8 + $0xe0] sm:$0xff]   ;;  %v2496_v17 = vld [vmem:[#allocation8 + $0xd8] sm:$0xff]   ;;  %v2499_v20 = vld [vmem:[#allocation8 + $0x50] sm:$0xff]   ;;  %p2742_p9 = por %p2741_p8, %p2740_p7 }
  0x3d   :  { %v2493_v14 = vld [vmem:[#allocation8 + $0x20] sm:$0xff]   ;;  %v2497_v18 = vld [vmem:[#allocation8 + $0x18] sm:$0xff]   ;;  %v2500_v21 = vld [vmem:[#allocation8 + $0xd0] sm:$0xff]  }
  0x3e   :  { %2229 = vmatpush3.bf16.msra.mxu0 %v2485_v6  ;;  %v2494_v15 = vld [vmem:[#allocation8 + $0xa0] sm:$0xff]   ;;  %v2498_v19 = vld [vmem:[#allocation8 + $0x98] sm:$0xff]   ;;  %v2501_v22 = vld [vmem:[#allocation8 + $0x10] sm:$0xff]   ;;  %p2743_p10 = pnand %p2742_p9, %p2736_p6 }
  0x3f   :  { %2251 = vmatpush3.bf16.msra.mxu1 %v2486_v7  ;;  %2230 = vmatprep.subr.bf16.mxu0 %v2487_v8  ;;  %v2502_v23 = vld [vmem:[#allocation8 + $0x90] sm:$0xff]   ;;  %v2503_v24 = vld [vmem:[#allocation8 + $0x48] sm:$0xff]   ;;  %v2507_v28 = vld [vmem:[#allocation8 + $0x40] sm:$0xff]  }
  0x40   :  { %2252 = vmatprep.subr.bf16.mxu1 %v2488_v9  ;;  %v2504_v25 = vld [vmem:[#allocation8 + $0xc8] sm:$0xff]   ;;  %v2508_v29 = vld [vmem:[#allocation8 + $0xc0] sm:$0xff]   ;;  %v132_v33 = vld [vmem:[#allocation5 + $0x38] sm:$0xff] }
  0x41   :  { %v2505_v26 = vld [vmem:[#allocation8 + $0x8] sm:$0xff]   ;;  %v2509_v30 = vld [vmem:[#allocation8] sm:$0xff]   ;;  %v128_v34 = vld [vmem:[#allocation5 + $0x18] sm:$0xff] }
  0x42   :  { %2231 = vmatpush3.bf16.msra.mxu0 %v2489_v10  ;;  %v2506_v27 = vld [vmem:[#allocation8 + $0x88] sm:$0xff]   ;;  %v2510_v31 = vld [vmem:[#allocation8 + $0x80] sm:$0xff]   ;;  %v131_v38 = vld [vmem:[#allocation5 + $0x30] sm:$0xff] }
  0x43   :  { %2253 = vmatpush3.bf16.msra.mxu1 %v2490_v11  ;;  %2232 = vmatprep.subr.bf16.mxu0 %v2491_v12  ;;  %v126_v32 = vld [vmem:[#allocation5 + $0x8] sm:$0xff]  ;;  %v125_v37 = vld [vmem:[#allocation5] sm:$0xff]  ;;  %v127_v41 = vld [vmem:[#allocation5 + $0x10] sm:$0xff] }
  0x44   :  { %2254 = vmatprep.subr.bf16.mxu1 %v2492_v13  ;;  %v138_v35 = vpack.c.bf16 %v132_v33, %v126_v32  ;;  %v134_v36 = vld [vmem:[#allocation5 + $0x48] sm:$0xff]  ;;  %v137_v40 = vpack.c.bf16 %v131_v38, %v125_v37  ;;  %v133_v42 = vld [vmem:[#allocation5 + $0x40] sm:$0xff]  ;;  %v2511_v44 = vld [vmem:[#allocation8 + $0x178] sm:$0xff]  }
  0x45   :  { %v140_v39 = vpack.c.bf16 %v134_v36, %v128_v34  ;;  %v139_v43 = vpack.c.bf16 %v133_v42, %v127_v41  ;;  %v2512_v45 = vld [vmem:[#allocation8 + $0x138] sm:$0xff]   ;;  %v2515_v48 = vld [vmem:[#allocation8 + $0x170] sm:$0xff]   ;;  %v2519_v52 = vld [vmem:[#allocation8 + $0x168] sm:$0xff]  }
  0x46   :  { %2233 = vmatpush3.bf16.msra.mxu0 %v2493_v14  ;;  %815 = vmatprep.mubr.bf16.mxu0 %v138_v35  ;;  %v2513_v46 = vld [vmem:[#allocation7 + $0x78] sm:$0xff]   ;;  %v2516_v49 = vld [vmem:[#allocation8 + $0x130] sm:$0xff]   ;;  %v2520_v53 = vld [vmem:[#allocation8 + $0x128] sm:$0xff]  }
  0x47   :  { %2255 = vmatpush3.bf16.msra.mxu1 %v2494_v15  ;;  %2234 = vmatprep.subr.bf16.mxu0 %v2495_v16  ;;  %v2514_v47 = vld [vmem:[#allocation7 + $0x38] sm:$0xff]   ;;  %v2517_v50 = vld [vmem:[#allocation7 + $0x70] sm:$0xff]   ;;  %v2521_v54 = vld [vmem:[#allocation7 + $0x68] sm:$0xff]  }
  0x48   :  { %2256 = vmatprep.subr.bf16.mxu1 %v2496_v17  ;;  %856 = vmatprep.mubr.bf16.mxu1 %v140_v39  ;;  %v2518_v51 = vld [vmem:[#allocation7 + $0x30] sm:$0xff]   ;;  %v2522_v55 = vld [vmem:[#allocation7 + $0x28] sm:$0xff]   ;;  %v2523_v56 = vld [vmem:[#allocation8 + $0x160] sm:$0xff]  }
  0x49   :  { %v2524_v57 = vld [vmem:[#allocation8 + $0x120] sm:$0xff]   ;;  %v2527_v60 = vld [vmem:[#allocation8 + $0x158] sm:$0xff]   ;;  %v2531_v0 = vld [vmem:[#allocation8 + $0x150] sm:$0xff]  }
  0x4a   :  { %2235 = vmatpush3.bf16.msra.mxu0 %v2497_v18  ;;  %v2525_v58 = vld [vmem:[#allocation7 + $0x60] sm:$0xff]   ;;  %v2528_v61 = vld [vmem:[#allocation8 + $0x118] sm:$0xff]   ;;  %v2532_v1 = vld [vmem:[#allocation8 + $0x110] sm:$0xff]  }
  0x4b   :  { %2257 = vmatpush3.bf16.msra.mxu1 %v2498_v19  ;;  %2236 = vmatprep.subr.bf16.mxu0 %v2499_v20  ;;  %v2526_v59 = vld [vmem:[#allocation7 + $0x20] sm:$0xff]   ;;  %v2529_v62 = vld [vmem:[#allocation7 + $0x58] sm:$0xff]   ;;  %v2533_v2 = vld [vmem:[#allocation7 + $0x50] sm:$0xff]  }
  0x4c   :  { %2258 = vmatprep.subr.bf16.mxu1 %v2500_v21  ;;  %v2530_v63 = vld [vmem:[#allocation7 + $0x18] sm:$0xff]   ;;  %v2534_v3 = vld [vmem:[#allocation7 + $0x10] sm:$0xff]   ;;  %v2535_v4 = vld [vmem:[#allocation8 + $0x148] sm:$0xff]  }
  0x4d   :  { %v2536_v5 = vld [vmem:[#allocation8 + $0x108] sm:$0xff]   ;;  %v2539_v8 = vld [vmem:[#allocation8 + $0x140] sm:$0xff]   ;;  %v136_v12 = vld [vmem:[#allocation5 + $0x58] sm:$0xff] }
  0x4e   :  { %2237 = vmatpush3.bf16.msra.mxu0 %v2501_v22  ;;  %v2537_v6 = vld [vmem:[#allocation7 + $0x48] sm:$0xff]   ;;  %v2540_v9 = vld [vmem:[#allocation8 + $0x100] sm:$0xff]   ;;  %v135_v16 = vld [vmem:[#allocation5 + $0x50] sm:$0xff] }
  0x4f   :  { %2259 = vmatpush3.bf16.msra.mxu1 %v2502_v23  ;;  %2238 = vmatprep.subr.bf16.mxu0 %v2503_v24  ;;  %v2538_v7 = vld [vmem:[#allocation7 + $0x8] sm:$0xff]   ;;  %v2541_v10 = vld [vmem:[#allocation7 + $0x40] sm:$0xff]   ;;  %v2543_v18 = vld [vmem:[#allocation7 + $0xf8] sm:$0xff]  }
  0x50   :  { %2260 = vmatprep.subr.bf16.mxu1 %v2504_v25  ;;  %v130_v11 = vld [vmem:[#allocation5 + $0x28] sm:$0xff]  ;;  %v2542_v14 = vld [vmem:[#allocation7] sm:$0xff]   ;;  %v2544_v22 = vld [vmem:[#allocation7 + $0xb8] sm:$0xff]  }
  0x51   :  { %v142_v13 = vpack.c.bf16 %v136_v12, %v130_v11  ;;  %v129_v15 = vld [vmem:[#allocation5 + $0x20] sm:$0xff]  ;;  %v78_v19 = vld [vmem:[#allocation2 + $0x8] sm:$0xff]  ;;  %v2560_v41 = vld [vmem:[#allocation7 + $0x98] sm:$0xff]  }
  0x52   :  { %2239 = vmatpush3.bf16.msra.mxu0 %v2505_v26  ;;  %v141_v17 = vpack.c.bf16 %v135_v16, %v129_v15  ;;  %v94_v20 = vld [vmem:[#allocation2 + $0x88] sm:$0xff]  ;;  %v77_v23 = vld [vmem:[#allocation2] sm:$0xff]  ;;  %v2545_v26 = vld [vmem:[#allocation7 + $0x178] sm:$0xff]  }
  0x53   :  { %2261 = vmatpush3.bf16.msra.mxu1 %v2506_v27  ;;  %2240 = vmatprep.subr.bf16.mxu0 %v2507_v28  ;;  %v110_v21 = vpack.c.bf16 %v94_v20, %v78_v19  ;;  %v93_v24 = vld [vmem:[#allocation2 + $0x80] sm:$0xff]  ;;  %v2546_v27 = vld [vmem:[#allocation7 + $0x138] sm:$0xff]   ;;  %v2547_v28 = vld [vmem:[#allocation7 + $0xf0] sm:$0xff]  }
  0x54   :  { %2262 = vmatprep.subr.bf16.mxu1 %v2508_v29  ;;  %v109_v25 = vpack.c.bf16 %v93_v24, %v77_v23  ;;  %v2548_v29 = vld [vmem:[#allocation7 + $0xb0] sm:$0xff]   ;;  %v2551_v32 = vld [vmem:[#allocation7 + $0xe8] sm:$0xff]   ;;  %v2555_v36 = vld [vmem:[#allocation7 + $0xe0] sm:$0xff]  }
  0x55   :  { %v2552_v33 = vld [vmem:[#allocation7 + $0xa8] sm:$0xff]   ;;  %v2556_v37 = vld [vmem:[#allocation7 + $0xa0] sm:$0xff]   ;;  %v2561_v42 = vld [vmem:[#allocation7 + $0x158] sm:$0xff]  }
  0x56   :  { %2241 = vmatpush3.bf16.msra.mxu0 %v2509_v30  ;;  %v2549_v30 = vld [vmem:[#allocation7 + $0x170] sm:$0xff]   ;;  %v2553_v34 = vld [vmem:[#allocation7 + $0x168] sm:$0xff]   ;;  %v2557_v38 = vld [vmem:[#allocation7 + $0x160] sm:$0xff]  }
  0x57   :  { %2263 = vmatpush3.bf16.msra.mxu1 %v2510_v31  ;;  %2270 = vmatprep.subr.bf16.mxu0 %v2511_v44  ;;  %v2550_v31 = vld [vmem:[#allocation7 + $0x130] sm:$0xff]   ;;  %v2554_v35 = vld [vmem:[#allocation7 + $0x128] sm:$0xff]   ;;  %v2558_v39 = vld [vmem:[#allocation7 + $0x120] sm:$0xff]  }
  0x58   :  { %2292 = vmatprep.subr.bf16.mxu1 %v2513_v46  ;;  %v2563_v44 = vld [vmem:[#allocation7 + $0xd0] sm:$0xff]   ;;  %v2583_v12 = vld [vmem:[#allocation7 + $0x1e8] sm:$0xff]   ;;  %v2587_v16 = vld [vmem:[#allocation7 + $0x1e0] sm:$0xff]  }
  0x59   :  { %816 = vmatmul.mubr.bf16.vlgmr.msra.gmra.mxu0 %v137_v40  ;;  %v2559_v40 = vld [vmem:[#allocation7 + $0xd8] sm:$0xff]   ;;  %v2565_v46 = vld [vmem:[#allocation7 + $0x150] sm:$0xff]   ;;  %v2586_v15 = vld [vmem:[#allocation7 + $0x228] sm:$0xff]  }
  0x5a   :  { %857 = vmatmul.mubr.bf16.vlgmr.msra.gmra.mxu1 %v139_v43  ;;  %2271 = vmatpush3.bf16.msra.mxu0 %v2512_v45  ;;  %v2562_v43 = vld [vmem:[#allocation7 + $0x118] sm:$0xff]   ;;  %v2564_v45 = vld [vmem:[#allocation7 + $0x90] sm:$0xff]   ;;  %v2590_v19 = vld [vmem:[#allocation7 + $0x220] sm:$0xff]  }
  0x5b   :  { %2293 = vmatpush3.bf16.msra.mxu1 %v2514_v47  ;;  %2272 = vmatprep.subr.bf16.mxu0 %v2515_v48  ;;  %v2566_v47 = vld [vmem:[#allocation7 + $0x110] sm:$0xff]   ;;  %v2567_v48 = vld [vmem:[#allocation7 + $0xc8] sm:$0xff]   ;;  %v2591_v20 = vld [vmem:[#allocation7 + $0x1d8] sm:$0xff]  }
  0x5c   :  { %2294 = vmatprep.subr.bf16.mxu1 %v2517_v50  ;;  %897 = vmatprep.mubr.bf16.mxu0 %v142_v13  ;;  %v2569_v50 = vld [vmem:[#allocation7 + $0x148] sm:$0xff]   ;;  %v2582_v11 = vld [vmem:[#allocation7 + $0x230] sm:$0xff]   ;;  %v2594_v23 = vld [vmem:[#allocation7 + $0x218] sm:$0xff]  }
  0x5d   :  { %1706 = vmatprep.mubr.bf16.mxu1 %v110_v21  ;;  %v2584_v13 = vld [vmem:[#allocation7 + $0x1a8] sm:$0xff]   ;;  %v2592_v21 = vld [vmem:[#allocation7 + $0x198] sm:$0xff]   ;;  %v2595_v24 = vld [vmem:[#allocation7 + $0x1d0] sm:$0xff]  }
  0x5e   :  { %2273 = vmatpush3.bf16.msra.mxu0 %v2516_v49  ;;  %v2568_v49 = vld [vmem:[#allocation7 + $0x88] sm:$0xff]  }
  0x5f   :  { %2295 = vmatpush3.bf16.msra.mxu1 %v2518_v51  ;;  %2274 = vmatprep.subr.bf16.mxu0 %v2519_v52  ;;  %v2570_v51 = vld [vmem:[#allocation7 + $0x108] sm:$0xff]   ;;  %v2571_v52 = vld [vmem:[#allocation7 + $0xc0] sm:$0xff]  }
  0x60   :  { %2296 = vmatprep.subr.bf16.mxu1 %v2521_v54  ;;  %v2573_v54 = vld [vmem:[#allocation7 + $0x140] sm:$0xff]  }
  0x62   :  { %2275 = vmatpush3.bf16.msra.mxu0 %v2520_v53  ;;  %v2572_v53 = vld [vmem:[#allocation7 + $0x80] sm:$0xff]  }
  0x63   :  { %2297 = vmatpush3.bf16.msra.mxu1 %v2522_v55  ;;  %2276 = vmatprep.subr.bf16.mxu0 %v2523_v56  ;;  %v80_v55 = vld [vmem:[#allocation2 + $0x18] sm:$0xff] }
  0x64   :  { %2298 = vmatprep.subr.bf16.mxu1 %v2525_v58  ;;  %v96_v56 = vld [vmem:[#allocation2 + $0x98] sm:$0xff]  ;;  %v2574_v58 = vld [vmem:[#allocation7 + $0x100] sm:$0xff]  }
  0x66   :  { %2277 = vmatpush3.bf16.msra.mxu0 %v2524_v57  ;;  %v112_v57 = vpack.c.bf16 %v96_v56, %v80_v55  ;;  %v2614_v55 = vld [vmem:[#allocation7 + $0x330] sm:$0xff]   ;;  %v2615_v56 = vld [vmem:[#allocation7 + $0x2e8] sm:$0xff]  }
  0x67   :  { %2299 = vmatpush3.bf16.msra.mxu1 %v2526_v59  ;;  %2278 = vmatprep.subr.bf16.mxu0 %v2527_v60  ;;  %v79_v59 = vld [vmem:[#allocation2 + $0x10] sm:$0xff] }
  0x68   :  { %2300 = vmatprep.subr.bf16.mxu1 %v2529_v62  ;;  %v95_v60 = vld [vmem:[#allocation2 + $0x90] sm:$0xff]  ;;  %v2575_v62 = vld [vmem:[#allocation7 + $0x1f8] sm:$0xff]  }
  0x6a   :  { %2279 = vmatpush3.bf16.msra.mxu0 %v2528_v61  ;;  %v111_v61 = vpack.c.bf16 %v95_v60, %v79_v59  ;;  %v2618_v59 = vld [vmem:[#allocation7 + $0x328] sm:$0xff]   ;;  %v2619_v60 = vld [vmem:[#allocation7 + $0x2e0] sm:$0xff]  }
  0x6b   :  { %2301 = vmatpush3.bf16.msra.mxu1 %v2530_v63  ;;  %2280 = vmatprep.subr.bf16.mxu0 %v2531_v0  ;;  %v82_v63 = vld [vmem:[#allocation2 + $0x28] sm:$0xff] }
  0x6c   :  { %2302 = vmatprep.subr.bf16.mxu1 %v2533_v2  ;;  %v98_v0 = vld [vmem:[#allocation2 + $0xa8] sm:$0xff]  ;;  %v2576_v2 = vld [vmem:[#allocation7 + $0x1b8] sm:$0xff]  }
  0x6e   :  { %2281 = vmatpush3.bf16.msra.mxu0 %v2532_v1  ;;  %v114_v1 = vpack.c.bf16 %v98_v0, %v82_v63  ;;  %v2622_v63 = vld [vmem:[#allocation7 + $0x320] sm:$0xff]   ;;  %v2623_v0 = vld [vmem:[#allocation7 + $0x2d8] sm:$0xff]  }
  0x6f   :  { %2303 = vmatpush3.bf16.msra.mxu1 %v2534_v3  ;;  %2282 = vmatprep.subr.bf16.mxu0 %v2535_v4  ;;  %v81_v3 = vld [vmem:[#allocation2 + $0x20] sm:$0xff] }
  0x70   :  { %2304 = vmatprep.subr.bf16.mxu1 %v2537_v6  ;;  %v97_v4 = vld [vmem:[#allocation2 + $0xa0] sm:$0xff]  ;;  %v2577_v6 = vld [vmem:[#allocation7 + $0x278] sm:$0xff]  }
  0x72   :  { %2283 = vmatpush3.bf16.msra.mxu0 %v2536_v5  ;;  %v113_v5 = vpack.c.bf16 %v97_v4, %v81_v3  ;;  %v2626_v3 = vld [vmem:[#allocation7 + $0x318] sm:$0xff]   ;;  %v2627_v4 = vld [vmem:[#allocation7 + $0x2d0] sm:$0xff]  }
  0x73   :  { %2305 = vmatpush3.bf16.msra.mxu1 %v2538_v7  ;;  %2284 = vmatprep.subr.bf16.mxu0 %v2539_v8  ;;  %v2578_v7 = vld [vmem:[#allocation7 + $0x238] sm:$0xff]   ;;  %v2579_v8 = vld [vmem:[#allocation7 + $0x1f0] sm:$0xff]  }
  0x74   :  { %2306 = vmatprep.subr.bf16.mxu1 %v2541_v10  ;;  %v2581_v10 = vld [vmem:[#allocation7 + $0x270] sm:$0xff]  }
  0x76   :  { %2285 = vmatpush3.bf16.msra.mxu0 %v2540_v9  ;;  %v2580_v9 = vld [vmem:[#allocation7 + $0x1b0] sm:$0xff]  }
  0x77   :  { %2307 = vmatpush3.bf16.msra.mxu1 %v2542_v14  ;;  %2314 = vmatprep.subr.bf16.mxu0 %v2543_v18  ;;  %v2585_v14 = vld [vmem:[#allocation7 + $0x268] sm:$0xff]   ;;  %v2589_v18 = vld [vmem:[#allocation7 + $0x260] sm:$0xff]  }
  0x78   :  { %2336 = vmatprep.subr.bf16.mxu1 %v2545_v26  ;;  %v2597_v26 = vld [vmem:[#allocation7 + $0x250] sm:$0xff]  }
  0x79   :  { %898 = vmatmul.mubr.bf16.vlgmr.msra.gmra.mxu0 %v141_v17  ;;  %v2588_v17 = vld [vmem:[#allocation7 + $0x1a0] sm:$0xff]  }
  0x7a   :  { %2315 = vmatpush3.bf16.msra.mxu0 %v2544_v22  ;;  %1707 = vmatmul.mubr.bf16.vlgmr.msra.gmra.mxu1 %v109_v25  ;;  %v2593_v22 = vld [vmem:[#allocation7 + $0x258] sm:$0xff]   ;;  %v2596_v25 = vld [vmem:[#allocation7 + $0x190] sm:$0xff]  }
  0x7b   :  { %2337 = vmatpush3.bf16.msra.mxu1 %v2546_v27  ;;  %2316 = vmatprep.subr.bf16.mxu0 %v2547_v28  ;;  %v2598_v27 = vld [vmem:[#allocation7 + $0x210] sm:$0xff]   ;;  %v2599_v28 = vld [vmem:[#allocation7 + $0x1c8] sm:$0xff]  }
  0x7c   :  { %2338 = vmatprep.subr.bf16.mxu1 %v2549_v30  ;;  %1747 = vmatprep.mubr.bf16.mxu0 %v112_v57  ;;  %v2601_v30 = vld [vmem:[#allocation7 + $0x248] sm:$0xff]  }
  0x7d   :  { %1788 = vmatprep.mubr.bf16.mxu1 %v114_v1  ;;  %v2616_v57 = vld [vmem:[#allocation7 + $0x2a8] sm:$0xff]   ;;  %v2624_v1 = vld [vmem:[#allocation7 + $0x298] sm:$0xff]  }
  0x7e   :  { %2317 = vmatpush3.bf16.msra.mxu0 %v2548_v29  ;;  %v2600_v29 = vld [vmem:[#allocation7 + $0x188] sm:$0xff]  }
  0x7f   :  { %2339 = vmatpush3.bf16.msra.mxu1 %v2550_v31  ;;  %2318 = vmatprep.subr.bf16.mxu0 %v2551_v32  ;;  %v2602_v31 = vld [vmem:[#allocation7 + $0x208] sm:$0xff]   ;;  %v2603_v32 = vld [vmem:[#allocation7 + $0x1c0] sm:$0xff]  }
  0x80   :  { %2340 = vmatprep.subr.bf16.mxu1 %v2553_v34  ;;  %v2605_v34 = vld [vmem:[#allocation7 + $0x240] sm:$0xff]  }
  0x82   :  { %2319 = vmatpush3.bf16.msra.mxu0 %v2552_v33  ;;  %v2604_v33 = vld [vmem:[#allocation7 + $0x180] sm:$0xff]  }
  0x83   :  { %2341 = vmatpush3.bf16.msra.mxu1 %v2554_v35  ;;  %2320 = vmatprep.subr.bf16.mxu0 %v2555_v36  ;;  %v84_v35 = vld [vmem:[#allocation2 + $0x38] sm:$0xff] }
  0x84   :  { %2342 = vmatprep.subr.bf16.mxu1 %v2557_v38  ;;  %v100_v36 = vld [vmem:[#allocation2 + $0xb8] sm:$0xff]  ;;  %v2606_v38 = vld [vmem:[#allocation7 + $0x200] sm:$0xff]  }
  0x86   :  { %2321 = vmatpush3.bf16.msra.mxu0 %v2556_v37  ;;  %v116_v37 = vpack.c.bf16 %v100_v36, %v84_v35  ;;  %v2646_v35 = vld [vmem:[#allocation7 + $0x3a0] sm:$0xff]   ;;  %v2647_v36 = vld [vmem:[#allocation7 + $0x3d8] sm:$0xff]  }
  0x87   :  { %2343 = vmatpush3.bf16.msra.mxu1 %v2558_v39  ;;  %2322 = vmatprep.subr.bf16.mxu0 %v2559_v40  ;;  %v83_v39 = vld [vmem:[#allocation2 + $0x30] sm:$0xff] }
  0x88   :  { %2344 = vmatprep.subr.bf16.mxu1 %v2561_v42  ;;  %v99_v40 = vld [vmem:[#allocation2 + $0xb0] sm:$0xff]  ;;  %v2607_v42 = vld [vmem:[#allocation7 + $0x2f8] sm:$0xff]  }
  0x8a   :  { %2323 = vmatpush3.bf16.msra.mxu0 %v2560_v41  ;;  %v115_v41 = vpack.c.bf16 %v99_v40, %v83_v39  ;;  %v92_v39 = vld [vmem:[#allocation2 + $0x78] sm:$0xff] }
  0x8b   :  { %2345 = vmatpush3.bf16.msra.mxu1 %v2562_v43  ;;  %2324 = vmatprep.subr.bf16.mxu0 %v2563_v44  ;;  %v86_v43 = vld [vmem:[#allocation2 + $0x48] sm:$0xff]  ;;  %v108_v40 = vld [vmem:[#allocation2 + $0xf8] sm:$0xff] }
  0x8c   :  { %2346 = vmatprep.subr.bf16.mxu1 %v2565_v46  ;;  %v102_v44 = vld [vmem:[#allocation2 + $0xc8] sm:$0xff]  ;;  %v2608_v46 = vld [vmem:[#allocation7 + $0x2b8] sm:$0xff]  }
  0x8e   :  { %2325 = vmatpush3.bf16.msra.mxu0 %v2564_v45  ;;  %v118_v45 = vpack.c.bf16 %v102_v44, %v86_v43  ;;  %v2651_v43 = vld [vmem:[#allocation7 + $0x3c8] sm:$0xff]  }
  0x8f   :  { %2347 = vmatpush3.bf16.msra.mxu1 %v2566_v47  ;;  %2326 = vmatprep.subr.bf16.mxu0 %v2567_v48  ;;  %v85_v47 = vld [vmem:[#allocation2 + $0x40] sm:$0xff]  ;;  %v2652_v44 = vld [vmem:[#allocation7 + $0x388] sm:$0xff]  }
  0x90   :  { %2348 = vmatprep.subr.bf16.mxu1 %v2569_v50  ;;  %v101_v48 = vld [vmem:[#allocation2 + $0xc0] sm:$0xff]  ;;  %v2609_v50 = vld [vmem:[#allocation7 + $0x378] sm:$0xff]  }
  0x92   :  { %2327 = vmatpush3.bf16.msra.mxu0 %v2568_v49  ;;  %v117_v49 = vpack.c.bf16 %v101_v48, %v85_v47  ;;  %v91_v47 = vld [vmem:[#allocation2 + $0x70] sm:$0xff] }
  0x93   :  { %2349 = vmatpush3.bf16.msra.mxu1 %v2570_v51  ;;  %2328 = vmatprep.subr.bf16.mxu0 %v2571_v52  ;;  %v2610_v51 = vld [vmem:[#allocation7 + $0x338] sm:$0xff]   ;;  %v2611_v52 = vld [vmem:[#allocation7 + $0x2f0] sm:$0xff]  }
  0x94   :  { %2350 = vmatprep.subr.bf16.mxu1 %v2573_v54  ;;  %v2613_v54 = vld [vmem:[#allocation7 + $0x370] sm:$0xff]  }
  0x95   :  { %v107_v48 = vld [vmem:[#allocation2 + $0xf0] sm:$0xff] }
  0x96   :  { %2329 = vmatpush3.bf16.msra.mxu0 %v2572_v53  ;;  %v2612_v53 = vld [vmem:[#allocation7 + $0x2b0] sm:$0xff]  }
  0x97   :  { %2351 = vmatpush3.bf16.msra.mxu1 %v2574_v58  ;;  %2358 = vmatprep.subr.bf16.mxu0 %v2575_v62  ;;  %v2617_v58 = vld [vmem:[#allocation7 + $0x368] sm:$0xff]   ;;  %v2621_v62 = vld [vmem:[#allocation7 + $0x360] sm:$0xff]  }
  0x98   :  { %2380 = vmatprep.subr.bf16.mxu1 %v2577_v6  ;;  %v2629_v6 = vld [vmem:[#allocation7 + $0x350] sm:$0xff]  }
  0x99   :  { %1748 = vmatmul.mubr.bf16.vlgmr.msra.gmra.mxu0 %v111_v61  ;;  %v2620_v61 = vld [vmem:[#allocation7 + $0x2a0] sm:$0xff]  }
  0x9a   :  { %2359 = vmatpush3.bf16.msra.mxu0 %v2576_v2  ;;  %1789 = vmatmul.mubr.bf16.vlgmr.msra.gmra.mxu1 %v113_v5  ;;  %v2625_v2 = vld [vmem:[#allocation7 + $0x358] sm:$0xff]   ;;  %v2628_v5 = vld [vmem:[#allocation7 + $0x290] sm:$0xff]  }
  0x9b   :  { %2381 = vmatpush3.bf16.msra.mxu1 %v2578_v7  ;;  %2360 = vmatprep.subr.bf16.mxu0 %v2579_v8  ;;  %v2630_v7 = vld [vmem:[#allocation7 + $0x310] sm:$0xff]   ;;  %v2631_v8 = vld [vmem:[#allocation7 + $0x2c8] sm:$0xff]  }
  0x9c   :  { %2382 = vmatprep.subr.bf16.mxu1 %v2581_v10  ;;  %1829 = vmatprep.mubr.bf16.mxu0 %v116_v37  ;;  %v2633_v10 = vld [vmem:[#allocation7 + $0x348] sm:$0xff]   ;;  %v2648_v37 = vld [vmem:[#allocation7 + $0x398] sm:$0xff]  }
  0x9d   :  { %1870 = vmatprep.mubr.bf16.mxu1 %v118_v45  ;;  %v2653_v45 = vld [vmem:[#allocation7 + $0x3c0] sm:$0xff]  }
  0x9e   :  { %2361 = vmatpush3.bf16.msra.mxu0 %v2580_v9  ;;  %v2632_v9 = vld [vmem:[#allocation7 + $0x288] sm:$0xff]  }
  0x9f   :  { %2383 = vmatpush3.bf16.msra.mxu1 %v2582_v11  ;;  %2362 = vmatprep.subr.bf16.mxu0 %v2583_v12  ;;  %v2634_v11 = vld [vmem:[#allocation7 + $0x308] sm:$0xff]   ;;  %v2635_v12 = vld [vmem:[#allocation7 + $0x2c0] sm:$0xff]  }
  0xa0   :  { %2384 = vmatprep.subr.bf16.mxu1 %v2585_v14  ;;  %v2637_v14 = vld [vmem:[#allocation7 + $0x340] sm:$0xff]  }
  0xa2   :  { %2363 = vmatpush3.bf16.msra.mxu0 %v2584_v13  ;;  %v2636_v13 = vld [vmem:[#allocation7 + $0x280] sm:$0xff]  }
  0xa3   :  { %2385 = vmatpush3.bf16.msra.mxu1 %v2586_v15  ;;  %2364 = vmatprep.subr.bf16.mxu0 %v2587_v16  ;;  %v88_v15 = vld [vmem:[#allocation2 + $0x58] sm:$0xff] }
  0xa4   :  { %2386 = vmatprep.subr.bf16.mxu1 %v2589_v18  ;;  %v104_v16 = vld [vmem:[#allocation2 + $0xd8] sm:$0xff]  ;;  %v2638_v18 = vld [vmem:[#allocation7 + $0x300] sm:$0xff]  }
  0xa6   :  { %2365 = vmatpush3.bf16.msra.mxu0 %v2588_v17  ;;  %v120_v17 = vpack.c.bf16 %v104_v16, %v88_v15 }
  0xa7   :  { %2387 = vmatpush3.bf16.msra.mxu1 %v2590_v19  ;;  %2366 = vmatprep.subr.bf16.mxu0 %v2591_v20  ;;  %v87_v19 = vld [vmem:[#allocation2 + $0x50] sm:$0xff] }
  0xa8   :  { %2388 = vmatprep.subr.bf16.mxu1 %v2593_v22  ;;  %v103_v20 = vld [vmem:[#allocation2 + $0xd0] sm:$0xff]  ;;  %v2639_v22 = vld [vmem:[#allocation7 + $0x3f8] sm:$0xff]  }
  0xaa   :  { %2367 = vmatpush3.bf16.msra.mxu0 %v2592_v21  ;;  %v119_v21 = vpack.c.bf16 %v103_v20, %v87_v19 }
  0xab   :  { %2389 = vmatpush3.bf16.msra.mxu1 %v2594_v23  ;;  %2368 = vmatprep.subr.bf16.mxu0 %v2595_v24  ;;  %v90_v23 = vld [vmem:[#allocation2 + $0x68] sm:$0xff] }
  0xac   :  { %2390 = vmatprep.subr.bf16.mxu1 %v2597_v26  ;;  %v106_v24 = vld [vmem:[#allocation2 + $0xe8] sm:$0xff]  ;;  %v2640_v26 = vld [vmem:[#allocation7 + $0x3b8] sm:$0xff]  }
  0xae   :  { %2369 = vmatpush3.bf16.msra.mxu0 %v2596_v25  ;;  %v122_v25 = vpack.c.bf16 %v106_v24, %v90_v23 }
  0xaf   :  { %2391 = vmatpush3.bf16.msra.mxu1 %v2598_v27  ;;  %2370 = vmatprep.subr.bf16.mxu0 %v2599_v28  ;;  %v89_v27 = vld [vmem:[#allocation2 + $0x60] sm:$0xff] }
  0xb0   :  { %2392 = vmatprep.subr.bf16.mxu1 %v2601_v30  ;;  %v105_v28 = vld [vmem:[#allocation2 + $0xe0] sm:$0xff]  ;;  %v2641_v30 = vld [vmem:[#allocation7 + $0x3f0] sm:$0xff]  }
  0xb2   :  { %2371 = vmatpush3.bf16.msra.mxu0 %v2600_v29  ;;  %v121_v29 = vpack.c.bf16 %v105_v28, %v89_v27 }
  0xb3   :  { %2393 = vmatpush3.bf16.msra.mxu1 %v2602_v31  ;;  %2372 = vmatprep.subr.bf16.mxu0 %v2603_v32  ;;  %v2642_v31 = vld [vmem:[#allocation7 + $0x3b0] sm:$0xff]   ;;  %v2643_v32 = vld [vmem:[#allocation7 + $0x3e8] sm:$0xff]  }
  0xb4   :  { %2394 = vmatprep.subr.bf16.mxu1 %v2605_v34  ;;  %v2645_v34 = vld [vmem:[#allocation7 + $0x3e0] sm:$0xff]  }
  0xb6   :  { %2373 = vmatpush3.bf16.msra.mxu0 %v2604_v33  ;;  %v2644_v33 = vld [vmem:[#allocation7 + $0x3a8] sm:$0xff]  }
  0xb7   :  { %2395 = vmatpush3.bf16.msra.mxu1 %v2606_v38  ;;  %2402 = vmatprep.subr.bf16.mxu0 %v2607_v42  ;;  %v2649_v38 = vld [vmem:[#allocation7 + $0x3d0] sm:$0xff]  }
  0xb8   :  { %2424 = vmatprep.subr.bf16.mxu1 %v2609_v50  ;;  %v2650_v42 = vld [vmem:[#allocation7 + $0x390] sm:$0xff]  }
  0xb9   :  { %1830 = vmatmul.mubr.bf16.vlgmr.msra.gmra.mxu0 %v115_v41  ;;  %v124_v41 = vpack.c.bf16 %v108_v40, %v92_v39 }
  0xba   :  { %2403 = vmatpush3.bf16.msra.mxu0 %v2608_v46  ;;  %1871 = vmatmul.mubr.bf16.vlgmr.msra.gmra.mxu1 %v117_v49  ;;  %v2654_v46 = vld [vmem:[#allocation7 + $0x380] sm:$0xff]   ;;  %v123_v49 = vpack.c.bf16 %v107_v48, %v91_v47 }
  0xbb   :  { %2425 = vmatpush3.bf16.msra.mxu1 %v2610_v51  ;;  %2404 = vmatprep.subr.bf16.mxu0 %v2611_v52 }
  0xbc   :  { %2426 = vmatprep.subr.bf16.mxu1 %v2613_v54  ;;  %1911 = vmatprep.mubr.bf16.mxu0 %v120_v17 }
  0xbd   :  { %1952 = vmatprep.mubr.bf16.mxu1 %v122_v25 }
  0xbe   :  { %2405 = vmatpush3.bf16.msra.mxu0 %v2612_v53 }
  0xbf   :  { %2427 = vmatpush3.bf16.msra.mxu1 %v2614_v55  ;;  %2406 = vmatprep.subr.bf16.mxu0 %v2615_v56 }
  0xc0   :  { %2428 = vmatprep.subr.bf16.mxu1 %v2617_v58 }
  0xc2   :  { %2407 = vmatpush3.bf16.msra.mxu0 %v2616_v57 }
  0xc3   :  { %2429 = vmatpush3.bf16.msra.mxu1 %v2618_v59  ;;  %2408 = vmatprep.subr.bf16.mxu0 %v2619_v60 }
  0xc4   :  { %2430 = vmatprep.subr.bf16.mxu1 %v2621_v62 }
  0xc6   :  { %2409 = vmatpush3.bf16.msra.mxu0 %v2620_v61 }
  0xc7   :  { %2431 = vmatpush3.bf16.msra.mxu1 %v2622_v63  ;;  %2410 = vmatprep.subr.bf16.mxu0 %v2623_v0 }
  0xc8   :  { %2432 = vmatprep.subr.bf16.mxu1 %v2625_v2 }
  0xca   :  { %2411 = vmatpush3.bf16.msra.mxu0 %v2624_v1 }
  0xcb   :  { %2433 = vmatpush3.bf16.msra.mxu1 %v2626_v3  ;;  %2412 = vmatprep.subr.bf16.mxu0 %v2627_v4 }
  0xcc   :  { %2434 = vmatprep.subr.bf16.mxu1 %v2629_v6 }
  0xce   :  { %2413 = vmatpush3.bf16.msra.mxu0 %v2628_v5 }
  0xcf   :  { %2435 = vmatpush3.bf16.msra.mxu1 %v2630_v7  ;;  %2414 = vmatprep.subr.bf16.mxu0 %v2631_v8 }
  0xd0   :  { %2436 = vmatprep.subr.bf16.mxu1 %v2633_v10 }
  0xd2   :  { %2415 = vmatpush3.bf16.msra.mxu0 %v2632_v9 }
  0xd3   :  { %2437 = vmatpush3.bf16.msra.mxu1 %v2634_v11  ;;  %2416 = vmatprep.subr.bf16.mxu0 %v2635_v12 }
  0xd4   :  { %2438 = vmatprep.subr.bf16.mxu1 %v2637_v14 }
  0xd6   :  { %2417 = vmatpush3.bf16.msra.mxu0 %v2636_v13 }
  0xd7   :  { %2439 = vmatpush3.bf16.msra.mxu1 %v2638_v18  ;;  %2446 = vmatprep.subr.bf16.mxu0 %v2639_v22 }
  0xd9   :  { %1912 = vmatmul.mubr.bf16.vlgmr.msra.gmra.mxu0 %v119_v21 }
  0xda   :  { %2447 = vmatpush3.bf16.msra.mxu0 %v2640_v26  ;;  %1953 = vmatmul.mubr.bf16.vlgmr.msra.gmra.mxu1 %v121_v29 }
  0xdb   :  { %2448 = vmatprep.subr.bf16.mxu0 %v2641_v30  ;;  %1993 = vmatprep.mubr.bf16.mxu0 %v124_v41 }
  0xde   :  { %2449 = vmatpush3.bf16.msra.mxu0 %v2642_v31 }
  0xdf   :  { %2450 = vmatprep.subr.bf16.mxu0 %v2643_v32 }
  0xe2   :  { %2451 = vmatpush3.bf16.msra.mxu0 %v2644_v33 }
  0xe3   :  { %2452 = vmatprep.subr.bf16.mxu0 %v2645_v34 }
  0xe6   :  { %2453 = vmatpush3.bf16.msra.mxu0 %v2646_v35 }
  0xe7   :  { %2454 = vmatprep.subr.bf16.mxu0 %v2647_v36 }
  0xea   :  { %2455 = vmatpush3.bf16.msra.mxu0 %v2648_v37 }
  0xeb   :  { %2456 = vmatprep.subr.bf16.mxu0 %v2649_v38 }
  0xee   :  { %2457 = vmatpush3.bf16.msra.mxu0 %v2650_v42 }
  0xef   :  { %2458 = vmatprep.subr.bf16.mxu0 %v2651_v43 }
  0xf2   :  { %2459 = vmatpush3.bf16.msra.mxu0 %v2652_v44 }
  0xf3   :  { %2460 = vmatprep.subr.bf16.mxu0 %v2653_v45 }
  0xf6   :  { %2461 = vmatpush3.bf16.msra.mxu0 %v2654_v46 }
  0xf9   :  { %1994 = vmatmul.mubr.bf16.vlgmr.msra.gmra.mxu0 %v123_v49 }
 0x119   :  { %v2242_v50 = vpop.f32.mrf.mxu0 }
 0x11a   :  { %v2264_v51 = vpop.f32.mrf.mxu1 }
 0x11b   :  { %v2243_v52 = vpop.f32.mrf.mxu0 }
 0x11c   :  { %v2265_v53 = vpop.f32.mrf.mxu1  ;;  %v2244_v13 = vadd.f32 %v2243_v52, %v2242_v50 }
 0x11d   :  { %v2245_v54 = vpop.f32.mrf.mxu0  ;;  %v2266_v14 = vadd.f32 %v2265_v53, %v2264_v51 }
 0x11e   :  { %v2267_v55 = vpop.f32.mrf.mxu1 }
 0x11f   :  { %v2246_v56 = vpop.f32.mrf.mxu0  ;;  %v859_v20 = vadd.f32 %v2266_v14, %v2244_v13 }
 0x120   :  { %v2268_v58 = vpop.f32.mrf.mxu1  ;;  %v2247_v17 = vadd.f32 %v2246_v56, %v2245_v54 }
 0x121   :  { %v2269_v18 = vadd.f32 %v2268_v58, %v2267_v55 }
 0x123   :  { %v862_v24 = vadd.f32 %v2269_v18, %v2247_v17 }
 0x139   :  { %v2286_v57 = vpop.f32.mrf.mxu0 }
 0x13a   :  { %v2308_v60 = vpop.f32.mrf.mxu1 }
 0x13b   :  { %v2287_v59 = vpop.f32.mrf.mxu0 }
 0x13c   :  { %v2309_v62 = vpop.f32.mrf.mxu1  ;;  %v2288_v19 = vadd.f32 %v2287_v59, %v2286_v57 }
 0x13d   :  { %v2289_v61 = vpop.f32.mrf.mxu0  ;;  %v2310_v26 = vadd.f32 %v2309_v62, %v2308_v60 }
 0x13e   :  { %v2311_v0 = vpop.f32.mrf.mxu1  ;;  %v900_v25 = vadd.f32 %v2288_v19, %v859_v20 }
 0x13f   :  { %v2290_v63 = vpop.f32.mrf.mxu0 }
 0x140   :  { %v2312_v2 = vpop.f32.mrf.mxu1  ;;  %v2291_v21 = vadd.f32 %v2290_v63, %v2289_v61  ;;  %v1709_v32 = vadd.f32 %v2310_v26, %v900_v25 }
 0x141   :  { %v2313_v29 = vadd.f32 %v2312_v2, %v2311_v0 }
 0x142   :  { %v903_v28 = vadd.f32 %v2291_v21, %v862_v24 }
 0x144   :  { %v1712_v36 = vadd.f32 %v2313_v29, %v903_v28 }
 0x159   :  { %v2330_v1 = vpop.f32.mrf.mxu0 }
 0x15a   :  { %v2352_v4 = vpop.f32.mrf.mxu1 }
 0x15b   :  { %v2331_v3 = vpop.f32.mrf.mxu0 }
 0x15c   :  { %v2353_v6 = vpop.f32.mrf.mxu1  ;;  %v2332_v30 = vadd.f32 %v2331_v3, %v2330_v1 }
 0x15d   :  { %v2333_v5 = vpop.f32.mrf.mxu0  ;;  %v2354_v38 = vadd.f32 %v2353_v6, %v2352_v4 }
 0x15e   :  { %v2355_v8 = vpop.f32.mrf.mxu1  ;;  %v1750_v37 = vadd.f32 %v2332_v30, %v1709_v32 }
 0x15f   :  { %v2334_v7 = vpop.f32.mrf.mxu0 }
 0x160   :  { %v2356_v10 = vpop.f32.mrf.mxu1  ;;  %v2335_v33 = vadd.f32 %v2334_v7, %v2333_v5  ;;  %v1791_v44 = vadd.f32 %v2354_v38, %v1750_v37  ;;  %v2216_v7 = vld [vmem:[%s2835_s4] ss:$0 sm:$0xff] }
 0x161   :  { %v2357_v40 = vadd.f32 %v2356_v10, %v2355_v8 }
 0x162   :  { %v1753_v39 = vadd.f32 %v2335_v33, %v1712_v36 }
 0x164   :  { %v1794_v46 = vadd.f32 %v2357_v40, %v1753_v39 }
 0x179   :  { %v2374_v9 = vpop.f32.mrf.mxu0 }
 0x17a   :  { %v2396_v12 = vpop.f32.mrf.mxu1 }
 0x17b   :  { %v2375_v11 = vpop.f32.mrf.mxu0 }
 0x17c   :  { %v2397_v16 = vpop.f32.mrf.mxu1  ;;  %v2376_v41 = vadd.f32 %v2375_v11, %v2374_v9 }
 0x17d   :  { %v2377_v15 = vpop.f32.mrf.mxu0  ;;  %v2398_v48 = vadd.f32 %v2397_v16, %v2396_v12 }
 0x17e   :  { %v2399_v23 = vpop.f32.mrf.mxu1  ;;  %v1832_v47 = vadd.f32 %v2376_v41, %v1791_v44 }
 0x17f   :  { %v2378_v22 = vpop.f32.mrf.mxu0 }
 0x180   :  { %v2400_v31 = vpop.f32.mrf.mxu1  ;;  %v2379_v45 = vadd.f32 %v2378_v22, %v2377_v15  ;;  %v1873_v54 = vadd.f32 %v2398_v48, %v1832_v47 }
 0x181   :  { %v2401_v52 = vadd.f32 %v2400_v31, %v2399_v23 }
 0x182   :  { %v1835_v51 = vadd.f32 %v2379_v45, %v1794_v46 }
 0x184   :  { %v1876_v58 = vadd.f32 %v2401_v52, %v1835_v51 }
 0x199   :  { %v2418_v27 = vpop.f32.mrf.mxu0 }
 0x19a   :  { %v2440_v35 = vpop.f32.mrf.mxu1 }
 0x19b   :  { %v2419_v34 = vpop.f32.mrf.mxu0 }
 0x19c   :  { %v2441_v43 = vpop.f32.mrf.mxu1  ;;  %v2420_v53 = vadd.f32 %v2419_v34, %v2418_v27 }
 0x19d   :  { %v2421_v42 = vpop.f32.mrf.mxu0  ;;  %v2442_v60 = vadd.f32 %v2441_v43, %v2440_v35 }
 0x19e   :  { %v2443_v50 = vpop.f32.mrf.mxu1  ;;  %v1914_v59 = vadd.f32 %v2420_v53, %v1873_v54 }
 0x19f   :  { %v2422_v49 = vpop.f32.mrf.mxu0 }
 0x1a0   :  { %v2423_v55 = vadd.f32 %v2422_v49, %v2421_v42  ;;  %v2444_v56 = vpop.f32.mrf.mxu1  ;;  %v1955_v2 = vadd.f32 %v2442_v60, %v1914_v59 }
 0x1a1   :  { %v2445_v63 = vadd.f32 %v2444_v56, %v2443_v50 }
 0x1a2   :  { %v1917_v62 = vadd.f32 %v2423_v55, %v1876_v58 }
 0x1a4   :  { %v1958_v4 = vadd.f32 %v2445_v63, %v1917_v62 }
 0x1b9   :  { %v2462_v57 = vpop.f32.mrf.mxu0 }
 0x1bb   :  { %v2463_v61 = vpop.f32.mrf.mxu0 }
 0x1bc   :  { %v2464_v0 = vadd.f32 %v2463_v61, %v2462_v57 }
 0x1bd   :  { %v2465_v1 = vpop.f32.mrf.mxu0 }
 0x1be   :  { %v1996_v5 = vadd.f32 %v2464_v0, %v1955_v2 }
 0x1bf   :  { %v2466_v3 = vpop.f32.mrf.mxu0 }
 0x1c0   :  { %v2467_v6 = vadd.f32 %v2466_v3, %v2465_v1  ;;  %v2009_v9 = vadd.f32 %v2216_v7, %v1996_v5 }
 0x1c2   :  { %v1999_v8 = vadd.f32 %v2467_v6, %v1958_v4 }
 0x1c4   :  { %v2010_v10 = vadd.f32 %v2216_v7, %v1999_v8 }
 0x1c6   :  { %v2224_v11 = vpack.c.bf16 %v2010_v10, %v2009_v9 }
 0x1c8   :  { %2225 = vst [vmem:[#allocation10] sm:$0xff] %v2224_v11  }
 0x1c9   :  { %2746 = shalt.err (!%p2743_p10)
}
 0x1ca   :  { %2032 = dma.vmem_to_hbm [thread:$0]  %s2027_s18, 128, %s2836_s5, [#allocation4], %s2770_s9, %s2770_s9, %s2771_s10  }
 0x1cb   :  { %2761 = dma.done.wait [#allocation4], 128  }
 0x1cc   :  { %2762 = vsyncadd [#allocation4], 4294967168 }
 0x1cd   :  { %2036 = vsyncpa [#allocation3], 1 }
 0x1ce   :  { %2037 = vsyncpa [#allocation6], 1 }
 0x1cf   :  { %2038 = vsyncpa [#allocation9], 1 }
 0x1d0   :  { %2039 = vsyncpa [#allocation4], 1 }

</bundles_post_ra>
